<compile_context>
chip_gen: v7x
topology: tpu7x:2x2x1
jax: 0.10.0
libtpu: 0.0.40
codegen_flags: <defaults>
</compile_context>

<pallas_src>
import functools

import jax
import jax.numpy as jnp
from jax import lax
from jax.experimental import pallas as pl
from jax.experimental.pallas import tpu as pltpu

GAMMA = 1.5
ALPHA = 0.25
LANES = 128
MAX_TM = 1024  # rows per tile: (1024,128) f32 = 512 KiB/input/block


def _qfocal_kernel(pred_ref, true_ref, out_ref, acc_ref, *,
                   gamma, alpha, total_n, tm, blocks_per_core, needs_mask):
    c = pl.program_id(0)           # core-split axis ("parallel")
    i = pl.program_id(1)           # row-block axis ("arbitrary")

    @pl.when(i == 0)
    def _():
        acc_ref[...] = jnp.zeros_like(acc_ref)

    x = pred_ref[...].astype(jnp.float32)
    y = true_ref[...].astype(jnp.float32)

    # Shared transcendental: e = exp(-|x|) feeds both the stable BCE log term
    # and the sigmoid (one exp instead of two).
    e = jnp.exp(-jnp.abs(x))
    bce = jnp.maximum(x, 0.0) - x * y + jnp.log1p(e)

    inv = 1.0 / (1.0 + e)                       # exact recip (tolerance-safe)
    p = jnp.where(x >= 0.0, inv, e * inv)       # == sigmoid(x), numerically stable

    alpha_factor = y * alpha + (1.0 - y) * (1.0 - alpha)
    t = jnp.abs(y - p)
    if gamma == 1.5:
        modulating = t * jnp.sqrt(t)            # avoid pow (= exp+log)
    elif gamma == 2.0:
        modulating = t * t
    elif gamma == 1.0:
        modulating = t
    else:
        modulating = t ** gamma
    loss = bce * alpha_factor * modulating

    if needs_mask:
        # Zero out contributions from wrapper padding (global index >= total_n).
        block = c * blocks_per_core + i
        row = lax.broadcasted_iota(jnp.int32, (tm, LANES), 0)
        lane = lax.broadcasted_iota(jnp.int32, (tm, LANES), 1)
        gidx = (block * tm + row) * LANES + lane
        loss = jnp.where(gidx < total_n, loss, 0.0)

    # VPU-only per-step reduce: fold tm rows onto the 8 accumulator sublanes
    # (adds whole vregs; no cross-lane XLU work until the epilogue).
    acc_ref[...] += loss.reshape(tm // 8, 8, LANES).sum(axis=0)

    @pl.when(i == pl.num_programs(1) - 1)
    def _():
        out_ref[0, 0] = jnp.sum(acc_ref[...])   # single XLU reduce per core


def qfocal_loss(pred, true, gamma=GAMMA, alpha=ALPHA):
    """QFocalLoss forward (reduction='mean'). pred/true: same shape, any rank."""
    assert pred.shape == true.shape
    total_n = pred.size

    # Lane-dense layout: pad the flat array up to a whole number of (tm,128)
    # blocks; the padded tail is masked inside the kernel.
    rows_needed = pl.cdiv(total_n, LANES)
    tm = min(MAX_TM, ((rows_needed + 7) // 8) * 8)   # multiple of 8, shrunk for tiny inputs
    num_blocks = pl.cdiv(rows_needed, tm)

    # Split row blocks across TensorCores (2 on v7x); sequential elsewhere.
    nc = 2 if num_blocks >= 2 else 1
    blocks_per_core = pl.cdiv(num_blocks, nc)
    padded_rows = nc * blocks_per_core * tm
    padded_n = padded_rows * LANES
    needs_mask = padded_n != total_n

    pred_flat = pred.reshape(-1)
    true_flat = true.reshape(-1)
    if needs_mask:
        pad = padded_n - total_n
        pred_flat = jnp.pad(pred_flat, (0, pad))
        true_flat = jnp.pad(true_flat, (0, pad))
    pred2 = pred_flat.reshape(padded_rows, LANES)
    true2 = true_flat.reshape(padded_rows, LANES)

    kernel = functools.partial(
        _qfocal_kernel, gamma=gamma, alpha=alpha, total_n=total_n,
        tm=tm, blocks_per_core=blocks_per_core, needs_mask=needs_mask)

    in_map = lambda c, i: (c * blocks_per_core + i, 0)

    partials = pl.pallas_call(
        kernel,
        out_shape=jax.ShapeDtypeStruct((nc, 1), jnp.float32),
        grid_spec=pltpu.PrefetchScalarGridSpec(
            num_scalar_prefetch=0,
            grid=(nc, blocks_per_core),
            in_specs=[
                pl.BlockSpec((tm, LANES), in_map),
                pl.BlockSpec((tm, LANES), in_map),
            ],
            out_specs=pl.BlockSpec(
                (1, 1), lambda c, i: (c, 0), memory_space=pltpu.SMEM
            ),
            scratch_shapes=[pltpu.VMEM((8, LANES), jnp.float32)],
        ),
        compiler_params=pltpu.CompilerParams(
            dimension_semantics=("parallel", "arbitrary")
        ),
    )(pred2, true2)

    return jnp.sum(partials) / jnp.float32(total_n)


def qfocal_loss_ref(pred, true, gamma=GAMMA, alpha=ALPHA):
    x = pred.astype(jnp.float32)
    y = true.astype(jnp.float32)
    bce = jnp.maximum(x, 0.0) - x * y + jnp.log1p(jnp.exp(-jnp.abs(x)))
    p = jax.nn.sigmoid(x)
    loss = bce * (y * alpha + (1 - y) * (1 - alpha)) * jnp.abs(y - p) ** gamma
    return jnp.mean(loss)


if __name__ == "__main__":
    key = jax.random.PRNGKey(0)
    k1, k2 = jax.random.split(key)
    # NCHW like the PyTorch convention: batch=2, channels=4, spatial=16x16
    pred = jax.random.normal(k1, (2, 4, 16, 16), dtype=jnp.float32)
    true = (jax.random.uniform(k2, (2, 4, 16, 16)) > 0.7).astype(jnp.float32)

    out = qfocal_loss(pred, true)
    out = jax.block_until_ready(out)

    ref = qfocal_loss_ref(pred, true)
    assert jnp.allclose(out, ref, rtol=1e-5, atol=1e-6), (out, ref)
    print("KERNEL_OK")
</pallas_src>

<mosaic_0001>
module attributes {stable_mosaic.version = 11 : i64} {
  func.func @_qfocal_kernel(%arg0: i32, %arg1: i32, %arg2: memref<16x128xf32, #tpu.memory_space<vmem>>, %arg3: memref<16x128xf32, #tpu.memory_space<vmem>>, %arg4: memref<1x1xf32, #tpu.memory_space<smem>>, %arg5: memref<8x128xf32, #tpu.memory_space<vmem>>) attributes {dimension_semantics = [#tpu.dimension_semantics<parallel>, #tpu.dimension_semantics<arbitrary>], iteration_bounds = array<i64: 1, 1>, scalar_prefetch = 0 : i64, scratch_operands = 1 : i64, tpu.core_type = #tpu.core_type<tc>, window_params = [{transform_indices = @transform_0, window_bounds = array<i64: 16, 128>}, {transform_indices = @transform_1, window_bounds = array<i64: 16, 128>}, {transform_indices = @transform_2, window_bounds = array<i64: 1, 1>}]} {
    %c0_i32 = arith.constant 0 : i32
    %0 = arith.cmpi eq, %arg1, %c0_i32 : i32
    %1 = arith.extui %0 : i1 to i32
    %c0_i32_0 = arith.constant 0 : i32
    %2 = arith.cmpi ne, %1, %c0_i32_0 : i32
    scf.if %2 {
      %cst_18 = arith.constant 0.000000e+00 : f32
      %44 = vector.broadcast %cst_18 : f32 to vector<8x128xf32>
      %c0_19 = arith.constant 0 : index
      %c0_20 = arith.constant 0 : index
      %45 = vector.load %arg5[%c0_19, %c0_20] : memref<8x128xf32, #tpu.memory_space<vmem>>, vector<8x128xf32>
      tpu.vector_store %arg5[%c0_19, %c0_20], %44 {strides = array<i32>} : memref<8x128xf32, #tpu.memory_space<vmem>>, vector<8x128xf32>,
    } else {
    }
    %c0 = arith.constant 0 : index
    %c0_1 = arith.constant 0 : index
    %3 = vector.load %arg2[%c0, %c0_1] : memref<16x128xf32, #tpu.memory_space<vmem>>, vector<16x128xf32>
    %c0_2 = arith.constant 0 : index
    %c0_3 = arith.constant 0 : index
    %4 = vector.load %arg3[%c0_2, %c0_3] : memref<16x128xf32, #tpu.memory_space<vmem>>, vector<16x128xf32>
    %5 = math.absf %3 : vector<16x128xf32>
    %cst = arith.constant 0.000000e+00 : f32
    %6 = vector.broadcast %cst : f32 to vector<16x128xf32>
    %7 = arith.subf %6, %5 : vector<16x128xf32>
    %8 = math.exp %7 : vector<16x128xf32>
    %cst_4 = arith.constant 0.000000e+00 : f32
    %9 = vector.broadcast %cst_4 : f32 to vector<16x128xf32>
    %10 = arith.maximumf %3, %9 : vector<16x128xf32>
    %11 = arith.mulf %3, %4 : vector<16x128xf32>
    %12 = arith.subf %10, %11 : vector<16x128xf32>
    %13 = math.log1p %8 : vector<16x128xf32>
    %14 = arith.addf %12, %13 : vector<16x128xf32>
    %cst_5 = arith.constant 1.000000e+00 : f32
    %15 = vector.broadcast %cst_5 : f32 to vector<16x128xf32>
    %16 = arith.addf %15, %8 : vector<16x128xf32>
    %cst_6 = arith.constant 1.000000e+00 : f32
    %17 = vector.broadcast %cst_6 : f32 to vector<16x128xf32>
    %18 = arith.divf %17, %16 : vector<16x128xf32>
    %cst_7 = arith.constant 0.000000e+00 : f32
    %19 = vector.broadcast %cst_7 : f32 to vector<16x128xf32>
    %20 = arith.cmpf oge, %3, %19 : vector<16x128xf32>
    %21 = arith.mulf %8, %18 : vector<16x128xf32>
    %22 = arith.select %20, %18, %21 : vector<16x128xi1>, vector<16x128xf32>
    %cst_8 = arith.constant 2.500000e-01 : f32
    %23 = vector.broadcast %cst_8 : f32 to vector<16x128xf32>
    %24 = arith.mulf %4, %23 : vector<16x128xf32>
    %cst_9 = arith.constant 1.000000e+00 : f32
    %25 = vector.broadcast %cst_9 : f32 to vector<16x128xf32>
    %26 = arith.subf %25, %4 : vector<16x128xf32>
    %cst_10 = arith.constant 7.500000e-01 : f32
    %27 = vector.broadcast %cst_10 : f32 to vector<16x128xf32>
    %28 = arith.mulf %26, %27 : vector<16x128xf32>
    %29 = arith.addf %24, %28 : vector<16x128xf32>
    %30 = arith.subf %4, %22 : vector<16x128xf32>
    %31 = math.absf %30 : vector<16x128xf32>
    %32 = math.sqrt %31 : vector<16x128xf32>
    %33 = arith.mulf %31, %32 : vector<16x128xf32>
    %34 = arith.mulf %14, %29 : vector<16x128xf32>
    %35 = arith.mulf %34, %33 : vector<16x128xf32>
    %c0_11 = arith.constant 0 : index
    %c0_12 = arith.constant 0 : index
    %36 = vector.load %arg5[%c0_11, %c0_12] : memref<8x128xf32, #tpu.memory_space<vmem>>, vector<8x128xf32>
    %37 = vector.shape_cast %35 : vector<16x128xf32> to vector<2x8x128xf32>
    %cst_13 = arith.constant dense<0.000000e+00> : vector<8x128xf32>
    %38 = vector.multi_reduction <add>, %37, %cst_13 [0] : vector<2x8x128xf32> to vector<8x128xf32>
    %39 = arith.addf %36, %38 : vector<8x128xf32>
    %c0_14 = arith.constant 0 : index
    %c0_15 = arith.constant 0 : index
    %40 = vector.load %arg5[%c0_14, %c0_15] : memref<8x128xf32, #tpu.memory_space<vmem>>, vector<8x128xf32>
    tpu.vector_store %arg5[%c0_14, %c0_15], %39 {strides = array<i32>} : memref<8x128xf32, #tpu.memory_space<vmem>>, vector<8x128xf32>,
    %c0_i32_16 = arith.constant 0 : i32
    %41 = arith.cmpi eq, %arg1, %c0_i32_16 : i32
    %42 = arith.extui %41 : i1 to i32
    %c0_i32_17 = arith.constant 0 : i32
    %43 = arith.cmpi ne, %42, %c0_i32_17 : i32
    scf.if %43 {
      %c0_18 = arith.constant 0 : index
      %c0_19 = arith.constant 0 : index
      %44 = vector.load %arg5[%c0_18, %c0_19] : memref<8x128xf32, #tpu.memory_space<vmem>>, vector<8x128xf32>
      %45 = vector.shape_cast %44 : vector<8x128xf32> to vector<1x8x128xf32>
      %cst_20 = arith.constant dense<0.000000e+00> : vector<1xf32>
      %46 = vector.multi_reduction <add>, %45, %cst_20 [1, 2] : vector<1x8x128xf32> to vector<1xf32>
      %47 = vector.shape_cast %46 : vector<1xf32> to vector<1x1x1xf32>
      %48 = vector.extract %47[0, 0, 0] : f32 from vector<1x1x1xf32>
      %c0_21 = arith.constant 0 : index
      %c0_22 = arith.constant 0 : index
      %49 = memref.load %arg4[%c0_21, %c0_22] : memref<1x1xf32, #tpu.memory_space<smem>>
      memref.store %48, %arg4[%c0_21, %c0_22] : memref<1x1xf32, #tpu.memory_space<smem>>
    } else {
    }
    return
  }
  func.func @transform_0(%arg0: i32, %arg1: i32) -> (i32, i32) {
    %c1_i32 = arith.constant 1 : i32
    %0 = arith.muli %arg0, %c1_i32 : i32
    %1 = arith.addi %0, %arg1 : i32
    %c0_i32 = arith.constant 0 : i32
    %c0_i32_0 = arith.constant 0 : i32
    return %1, %c0_i32 : i32, i32
  }
  func.func @transform_1(%arg0: i32, %arg1: i32) -> (i32, i32) {
    %c1_i32 = arith.constant 1 : i32
    %0 = arith.muli %arg0, %c1_i32 : i32
    %1 = arith.addi %0, %arg1 : i32
    %c0_i32 = arith.constant 0 : i32
    %c0_i32_0 = arith.constant 0 : i32
    return %1, %c0_i32 : i32, i32
  }
  func.func @transform_2(%arg0: i32, %arg1: i32) -> (i32, i32) {
    %c0_i32 = arith.constant 0 : i32
    %c0_i32_0 = arith.constant 0 : i32
    return %arg0, %c0_i32 : i32, i32
  }
}

</mosaic_0001>

<bundles_post_ra>
// kernel: tpu_custom_call.1
= control target key start
LH: loop header
LB: loop body
LE: loop exit
PB: predicated region body
PF: predicated region fallthrough
CT: control target
= control target key end

     0   :  { %7 = vsyncpa [#allocation4], 0  ;;  %s312_s0 = inlined_call_operand.hbm [shape: f32[16,128], index: 0, kind: input, shape index: {}]   ;;  %s313_s1 = inlined_call_operand.hbm [shape: f32[16,128], index: 1, kind: input, shape index: {}]   ;;  %s314_s2 = inlined_call_operand.hbm [shape: f32[1,1], index: 2, kind: output, shape index: {}]  }
   0x1   :  { %8 = vsyncpa [#allocation7], 0 }
   0x2   :  { %9 = vsyncpa [#allocation5], 0  ;;  %s256_s9 = smov [#allocation3]   ;;  %s196_s13 = scalar_lea.hbm %s312_s0, 256 }
   0x3   :  { %s19_s10 = sshll.u32 %s256_s9, 4  ;;  %p197_p0 = scmp.ne.s32.totalorder %s312_s0, %s196_s13  ;;  %s20_s10 = int_to_ptr.vmem [resolvable:$true] %s19_s10 }
   0x4   :  { %p200_p1 = scmp.lt.u32.totalorder %s196_s13, %s312_s0 }
   0x6   :  { %p202_p2 = pnand %p200_p1, %p197_p0 }
   0x8   :  { %205 = shalt.err (!%p202_p2)
}
   0x9   :  { %s206_s18 = scalar_lea.vmem %s20_s10, 256  ;;  %p211_p4 = scmp.lt.s32.totalorder %s20_s10, %s20_s10 }
   0xa   :  { %p207_p3 = scmp.ne.s32.totalorder %s20_s10, %s206_s18  ;;  %p212_p5 = scmp.lt.s32.totalorder %s206_s18, %s206_s18 }
   0xc   :  { %p213_p6 = por %p212_p5, %p211_p4 }
   0xe   :  { %p214_p7 = pnand %p213_p6, %p207_p3 }
  0x10   :  { %217 = shalt.err (!%p214_p7)
}
  0x11   :  { %s257_s19 = smov 128   ;;  %s258_s20 = smov 8  }
  0x12   :  { %25 = dma.hbm_to_vmem [thread:$0]  %s312_s0, 256, %s20_s10, [#allocation4], %s257_s19, %s257_s19, %s258_s20  }
  0x13   :  { %s259_s23 = smov [#allocation6]   ;;  %s218_s27 = scalar_lea.hbm %s313_s1, 256 }
  0x14   :  { %s35_s24 = sshll.u32 %s259_s23, 4  ;;  %p219_p8 = scmp.ne.s32.totalorder %s313_s1, %s218_s27  ;;  %s36_s24 = int_to_ptr.vmem [resolvable:$true] %s35_s24 }
  0x15   :  { %p222_p9 = scmp.lt.u32.totalorder %s218_s27, %s313_s1 }
  0x17   :  { %p224_p10 = pnand %p222_p9, %p219_p8 }
  0x19   :  { %227 = shalt.err (!%p224_p10)
}
  0x1a   :  { %s228_s4 = scalar_lea.vmem %s36_s24, 256  ;;  %p233_p12 = scmp.lt.s32.totalorder %s36_s24, %s36_s24 }
  0x1b   :  { %p229_p11 = scmp.ne.s32.totalorder %s36_s24, %s228_s4  ;;  %p234_p13 = scmp.lt.s32.totalorder %s228_s4, %s228_s4 }
  0x1d   :  { %p235_p0 = por %p234_p13, %p233_p12 }
  0x1f   :  { %p236_p1 = pnand %p235_p0, %p229_p11 }
  0x21   :  { %239 = shalt.err (!%p236_p1)
}
  0x22   :  { %41 = dma.hbm_to_vmem [thread:$0]  %s313_s1, 256, %s36_s24, [#allocation7], %s257_s19, %s257_s19, %s258_s20  }
  0x23   :  { %250 = dma.done.wait [#allocation4], 256  }
  0x24   :  { %251 = vsyncadd [#allocation4], 4294967040 }
  0x25   :  { %252 = dma.done.wait [#allocation7], 256  }
  0x26   :  { %253 = vsyncadd [#allocation7], 4294967040  ;;  %v57_v0 = vld [vmem:[#allocation3] sm:$0xff]  ;;  %v58_v1 = vld [vmem:[#allocation3 + $0x8] sm:$0xff]  ;;  %s240_s8 = scalar_lea.hbm %s314_s2, 16 }
  0x27   :  { %v61_v2 = vand.u32 2147483647, %v57_v0  ;;  %v62_v3 = vand.u32 2147483647, %v58_v1  ;;  %vm101_vm0 = vcmp.ge.f32.partialorder %v57_v0, 0.0  ;;  %v59_v14 = vld [vmem:[#allocation6] sm:$0xff]  ;;  %p241_p2 = scmp.ne.s32.totalorder %s314_s2, %s240_s8  ;;  %p244_p3 = scmp.lt.u32.totalorder %s240_s8, %s314_s2 }
  0x28   :  { %vm102_vm1 = vcmp.ge.f32.partialorder %v58_v1, 0.0  ;;  %v60_v16 = vld [vmem:[#allocation6 + $0x8] sm:$0xff]  ;;  %v69_v31 = vmax.f32 %v57_v0, 0.0  ;;  %v70_v33 = vmax.f32 %v58_v1, 0.0  ;;  %v71_v34 = vmul.f32 %v59_v14, %v57_v0 }
  0x29   :  { %v63_v4 = vsub.f32 0.0, %v61_v2  ;;  %v64_v5 = vsub.f32 0.0, %v62_v3  ;;  %v109_v35 = vsub.f32 1.0, %v59_v14  ;;  %v72_v36 = vmul.f32 %v60_v16, %v58_v1  ;;  %p246_p4 = pnand %p244_p3, %p241_p2 }
  0x2a   :  { %v110_v39 = vsub.f32 1.0, %v60_v16  ;;  %v73_v42 = vsub.f32 %v69_v31, %v71_v34  ;;  %v107_v43 = vmul.f32 0.25, %v59_v14  ;;  %v108_v47 = vmul.f32 0.25, %v60_v16 }
  0x2b   :  { %v65_v6 = vmul.f32 1.442695, %v63_v4  ;;  %v67_v7 = vmul.f32 1.442695, %v64_v5  ;;  %v111_v44 = vmul.f32 0.75, %v109_v35  ;;  %v74_v45 = vsub.f32 %v70_v33, %v72_v36 }
  0x2c   :  { %v112_v48 = vmul.f32 0.75, %v110_v39 }
  0x2d   :  { %180 = vpow2.f32 %v65_v6  ;;  %v113_v51 = vadd.f32 %v111_v44, %v107_v43 }
  0x2e   :  { %182 = vpow2.f32 %v67_v7  ;;  %v114_v54 = vadd.f32 %v112_v48, %v108_v47 }
  0x37   :  { %v181_v8 = vpop.eup %180 }
  0x38   :  { %v183_v9 = vpop.eup %182  ;;  %v75_v10 = vadd.f32 1.0, %v181_v8  ;;  %v78_v17 = vmul.f32 -0.5, %v181_v8  ;;  %v81_v27 = vand.u32 2147483647, %v181_v8 }
  0x39   :  { %v84_v11 = vadd.f32 1.0, %v183_v9  ;;  %v87_v19 = vmul.f32 -0.5, %v183_v9  ;;  %v90_v32 = vand.u32 2147483647, %v183_v9 }
  0x3a   :  { %184 = vrcp.f32 %v75_v10  ;;  %v79_v24 = vadd.f32 1.0, %v78_v17  ;;  %vm82_vm2 = vcmp.lt.f32.partialorder %v81_v27, 0.0004427343 }
  0x3b   :  { %186 = vrcp.f32 %v84_v11  ;;  %v88_v28 = vadd.f32 1.0, %v87_v19  ;;  %vm91_vm3 = vcmp.lt.f32.partialorder %v90_v32, 0.0004427343 }
  0x3c   :  { %188 = vlog2.f32 %v75_v10  ;;  %v80_v38 = vmul.f32 %v181_v8, %v79_v24 }
  0x3d   :  { %190 = vlog2.f32 %v84_v11  ;;  %v89_v41 = vmul.f32 %v183_v9, %v88_v28 }
  0x44   :  { %v185_v12 = vpop.eup %184 }
  0x45   :  { %v187_v13 = vpop.eup %186  ;;  %v103_v15 = vmul.f32 %v185_v12, %v181_v8 }
  0x46   :  { %v104_v18 = vmul.f32 %v187_v13, %v183_v9  ;;  %v189_v26 = vpop.eup %188 }
  0x47   :  { %v105_v20 = vsel %vm101_vm0, %v185_v12, %v103_v15  ;;  %v191_v30 = vpop.eup %190  ;;  %v77_v37 = vmul.f32 0.6931472, %v189_v26 }
  0x48   :  { %v106_v21 = vsel %vm102_vm1, %v187_v13, %v104_v18  ;;  %v115_v22 = vsub.f32 %v59_v14, %v105_v20  ;;  %v86_v40 = vmul.f32 0.6931472, %v191_v30 }
  0x49   :  { %v116_v23 = vsub.f32 %v60_v16, %v106_v21  ;;  %v83_v46 = vsel %vm82_vm2, %v80_v38, %v77_v37 }
  0x4a   :  { %v117_v25 = vand.u32 2147483647, %v115_v22  ;;  %v92_v49 = vsel %vm91_vm3, %v89_v41, %v86_v40  ;;  %v93_v50 = vadd.f32 %v83_v46, %v73_v42 }
  0x4b   :  { %v118_v29 = vand.u32 2147483647, %v116_v23  ;;  %v94_v53 = vadd.f32 %v92_v49, %v74_v45 }
  0x4c   :  { %192 = vrsqrt.f32 %v117_v25  ;;  %vm121_vm4 = vcmp.eq.f32.partialorder %v117_v25, inf  ;;  %v124_v55 = vand.u32 2147483648, %v117_v25  ;;  %vm123_vm5 = vcmp.eq.f32.partialorder %v117_v25, 0.0 }
  0x4d   :  { %194 = vrsqrt.f32 %v118_v29  ;;  %vm128_vm6 = vcmp.eq.f32.partialorder %v118_v29, inf  ;;  %v131_v58 = vand.u32 2147483648, %v118_v29  ;;  %vm130_vm7 = vcmp.eq.f32.partialorder %v118_v29, 0.0 }
  0x4e   :  { %v135_v61 = vmul.f32 %v113_v51, %v93_v50  ;;  %v136_v0 = vmul.f32 %v114_v54, %v94_v53 }
  0x56   :  { %v193_v52 = vpop.eup %192 }
  0x57   :  { %v195_v56 = vpop.eup %194  ;;  %v120_v57 = vmul.f32 %v193_v52, %v117_v25 }
  0x58   :  { %v127_v59 = vmul.f32 %v195_v56, %v118_v29 }
  0x59   :  { %v122_v60 = vsel %vm121_vm4, %v117_v25, %v120_v57 }
  0x5a   :  { %v125_v62 = vsel %vm123_vm5, %v124_v55, %v122_v60  ;;  %v129_v63 = vsel %vm128_vm6, %v118_v29, %v127_v59 }
  0x5b   :  { %v132_v1 = vsel %vm130_vm7, %v131_v58, %v129_v63  ;;  %v133_v2 = vmul.f32 %v125_v62, %v117_v25 }
  0x5c   :  { %v134_v3 = vmul.f32 %v132_v1, %v118_v29 }
  0x5d   :  { %v137_v4 = vmul.f32 %v135_v61, %v133_v2 }
  0x5e   :  { %v138_v5 = vmul.f32 %v136_v0, %v134_v3 }
  0x60   :  { %v140_v6 = vadd.f32 %v138_v5, %v137_v4 }
  0x62   :  { %147 = vadd.xlane.f32.xlu0 %v140_v6 }
  0xef   :  { %v148_v7 = vpop.xlane.xlu0 %147 }
  0xf0   :  { %v149_v8 = vrot.slane %v148_v7, 4 }
  0xf2   :  { %v150_v9 = vadd.f32 %v149_v8, %v148_v7 }
  0xf4   :  { %v151_v10 = vrot.slane %v150_v9, 2 }
  0xf6   :  { %v152_v11 = vadd.f32 %v151_v10, %v150_v9 }
  0xf8   :  { %v153_v12 = vrot.slane %v152_v11, 1 }
  0xfa   :  { %v154_v13 = vadd.f32 %v153_v12, %v152_v11 }
  0xfc   :  { %173 = vpush %v154_v13 }
 0x12d   :  { %s174_s1 = spop %173 }
 0x12e   :  { %157 = sst [smem:[#allocation8]] %s174_s1 }
 0x12f   :  { %249 = shalt.err (!%p246_p4)
}
 0x130   :  { %s260_s13 = smov [#allocation8]  }
 0x131   :  { %165 = dma.smem_to_hbm %s260_s13, 16, %s314_s2, [#allocation5]  }
 0x132   :  { %254 = dma.done.wait [#allocation5], 16  }
 0x133   :  { %255 = vsyncadd [#allocation5], 4294967280 }
 0x134   :  { %169 = sfence }
 0x135   :  { %170 = vsyncpa [#allocation4], 1 }
 0x136   :  { %171 = vsyncpa [#allocation7], 1 }
 0x137   :  { %172 = vsyncpa [#allocation5], 1 }

</bundles_post_ra>
